<compile_context>
chip_gen: v6e
topology: v6e:2x2x1
jax: 0.10.0
libtpu: 0.0.40
codegen_flags: <defaults>
</compile_context>

<pallas_src>
import functools

import jax
import jax.numpy as jnp
from jax.experimental import pallas as pl
from jax.experimental.pallas import tpu as pltpu


def _round_up(x, m):
    return ((x + m - 1) // m) * m


# --------------------------------------------------------------------------
# Hardware queries (best-effort; conservative fallbacks keep the kernel valid
# on every generation).
# --------------------------------------------------------------------------
def _vmem_capacity_bytes():
    try:
        return int(pltpu.get_tpu_info().vmem_capacity_bytes)
    except Exception:
        return 64 * 1024 * 1024  # conservative: v7x per-TC VMEM


def _is_pre_v6():
    try:
        kind = jax.devices()[0].device_kind.lower()
    except Exception:
        return True  # conservative: keep f32 epilogue
    return ("v5" in kind) or ("v4" in kind)


# --------------------------------------------------------------------------
# Kernels
# --------------------------------------------------------------------------
def _resident_kernel(x_ref, w1_ref, b1_ref, w2_ref, b2_ref, o_ref,
                     *, compute_dtype, epilogue_dtype):
    # Layer 1: bf16 MXU matmul, f32 accumulate, bias + tanh in epilogue dtype.
    x = x_ref[...].astype(compute_dtype)
    h = jnp.dot(x, w1_ref[...], preferred_element_type=jnp.float32)
    h = jnp.tanh((h + b1_ref[...]).astype(epilogue_dtype))
    # Layer 2: bf16 MXU matmul, f32 epilogue (plain_last=False -> tanh applied).
    y = jnp.dot(h.astype(compute_dtype), w2_ref[...],
                preferred_element_type=jnp.float32)
    y = jnp.tanh(y + b2_ref[...])
    o_ref[...] = y.astype(o_ref.dtype)


def _ktiled_kernel(x_ref, w1_ref, b1_ref, w2_ref, b2_ref, o_ref, acc_ref,
                   *, compute_dtype, epilogue_dtype):
    # Hidden dim is tiled along grid axis 1; the layer-1 nonlinearity is
    # per-hidden-unit, so computing tanh(x @ W1[:, chunk] + b1[chunk]) per
    # chunk and accumulating its layer-2 partial product is exact.
    k = pl.program_id(1)

    @pl.when(k == 0)
    def _():
        acc_ref[...] = jnp.zeros_like(acc_ref)

    x = x_ref[...].astype(compute_dtype)
    h = jnp.dot(x, w1_ref[...], preferred_element_type=jnp.float32)
    h = jnp.tanh((h + b1_ref[...]).astype(epilogue_dtype))
    acc_ref[...] += jnp.dot(h.astype(compute_dtype), w2_ref[...],
                            preferred_element_type=jnp.float32)

    @pl.when(k == pl.num_programs(1) - 1)
    def _():
        o_ref[...] = jnp.tanh(acc_ref[...] + b2_ref[...]).astype(o_ref.dtype)


# --------------------------------------------------------------------------
# One-time parameter layout (hoisted out of the per-call hot path).
# --------------------------------------------------------------------------
def prepare_mlp_params(w1, b1, w2, b2, *, compute_dtype=jnp.bfloat16):
    """[out,in] -> [in,out], zero-pad feature dims to multiples of 128, cast
    matmul operands to bf16.  Zero-padding is exact: padded hidden units have
    w=0, b=0 -> tanh(0)=0 contributes nothing; padded rows/cols are sliced off
    by the caller."""
    hid, cin = w1.shape
    cout, hid2 = w2.shape
    assert hid2 == hid
    cin_p = _round_up(int(cin), 128)
    hid_p = _round_up(int(hid), 128)
    cout_p = _round_up(int(cout), 128)

    w1_p = jnp.pad(jnp.transpose(w1),
                   ((0, cin_p - cin), (0, hid_p - hid))).astype(compute_dtype)
    w2_p = jnp.pad(jnp.transpose(w2),
                   ((0, hid_p - hid), (0, cout_p - cout))).astype(compute_dtype)
    b1_p = jnp.pad(b1, (0, hid_p - hid)).reshape(1, hid_p).astype(jnp.float32)
    b2_p = jnp.pad(b2, (0, cout_p - cout)).reshape(1, cout_p).astype(jnp.float32)

    return {
        "w1": w1_p, "b1": b1_p, "w2": w2_p, "b2": b2_p,
        "dims": (int(cin), int(hid), int(cout)),
        "compute_dtype": compute_dtype,
    }


# --------------------------------------------------------------------------
# Rough VMEM footprint models (used to size tiles / choose the K-tiled path).
# --------------------------------------------------------------------------
def _resident_vmem_bytes(tm, cin_p, hid_p, cout_p, x_bytes, out_bytes, ep_bytes):
    weights = (cin_p * hid_p + hid_p * cout_p) * 2        # bf16, single-buffered
    biases = (hid_p + cout_p) * 4
    io = 2 * tm * (cin_p * x_bytes + cout_p * out_bytes)  # double-buffered x / out
    tmp = tm * (cin_p * 2 + hid_p * (4 + ep_bytes) + cout_p * 4)
    return weights + biases + io + tmp


def _ktiled_vmem_bytes(tm, tk, cin_p, cout_p, x_bytes, out_bytes, ep_bytes):
    weights = 2 * (cin_p * tk + tk * cout_p) * 2 + 2 * tk * 4 + cout_p * 4
    io = 2 * tm * (cin_p * x_bytes + cout_p * out_bytes)
    acc = tm * cout_p * 4
    tmp = tm * (cin_p * 2 + tk * (4 + ep_bytes) + cout_p * 4)
    return weights + io + acc + tmp


# --------------------------------------------------------------------------
# Forward
# --------------------------------------------------------------------------
def mlp_forward(x, params):
    """x: [N, in_channels]; params from prepare_mlp_params()."""
    w1_p, b1_p, w2_p, b2_p = params["w1"], params["b1"], params["w2"], params["b2"]
    cin, hid, cout = params["dims"]
    compute_dtype = params["compute_dtype"]
    cin_p, hid_p = w1_p.shape
    cout_p = w2_p.shape[1]

    n = x.shape[0]
    x_bytes = x.dtype.itemsize
    out_dtype = x.dtype                      # emit output in input dtype directly
    out_bytes = jnp.dtype(out_dtype).itemsize

    epilogue_dtype = jnp.float32 if _is_pre_v6() else compute_dtype
    ep_bytes = jnp.dtype(epilogue_dtype).itemsize

    # Generation-aware VMEM budget and max batch tile.
    vmem_cap = _vmem_capacity_bytes()
    vmem_limit = min((vmem_cap * 3) // 4, 100 * 1024 * 1024)  # 96 MiB on 128 MiB parts, 48 MiB on v7x
    tm_max = 1024 if vmem_cap >= 128 * 1024 * 1024 else 512
    budget = int(0.9 * vmem_limit)

    # Batch tile: aim for >=2 grid steps (both v7x TCs busy via the "parallel"
    # axis) while minimizing padded rows; 16-row alignment matches bf16 (16,128)
    # sublane packing.
    tm = min(tm_max, max(16, _round_up(-(-n // 2), 16)))

    use_ktiled = _resident_vmem_bytes(min(tm, 128), cin_p, hid_p, cout_p,
                                      x_bytes, out_bytes, ep_bytes) > budget
    if not use_ktiled:
        while tm > 16 and _resident_vmem_bytes(tm, cin_p, hid_p, cout_p,
                                               x_bytes, out_bytes, ep_bytes) > budget:
            tm = max(16, _round_up(tm // 2, 16))
    else:
        tm = min(tm, 256)  # K-tiled path: keep the f32 accumulator tile moderate

    n_p = _round_up(n, tm)
    x_p = x if (n_p == n and cin_p == cin) else jnp.pad(
        x, ((0, n_p - n), (0, cin_p - cin)))

    cost = pl.CostEstimate(
        flops=2 * n_p * (cin_p * hid_p + hid_p * cout_p),
        transcendentals=n_p * (hid_p + cout_p),
        bytes_accessed=(n_p * cin_p * x_bytes
                        + (cin_p * hid_p + hid_p * cout_p) * 2
                        + (hid_p + cout_p) * 4
                        + n_p * cout_p * out_bytes),
    )
    out_shape = jax.ShapeDtypeStruct((n_p, cout_p), out_dtype)

    if not use_ktiled:
        kernel = functools.partial(_resident_kernel,
                                   compute_dtype=compute_dtype,
                                   epilogue_dtype=epilogue_dtype)

        def build(single_buffer_weights):
            resident = ({"pipeline_mode": pl.Buffered(1)}
                        if single_buffer_weights else {})
            grid_spec = pltpu.PrefetchScalarGridSpec(
                num_scalar_prefetch=0,
                grid=(n_p // tm,),
                in_specs=[
                    # x: one row tile per grid step (auto double-buffered).
                    pl.BlockSpec((tm, cin_p), lambda i: (i, 0)),
                    # weights / biases: constant index_map -> VMEM-resident.
                    pl.BlockSpec((cin_p, hid_p), lambda i: (0, 0), **resident),
                    pl.BlockSpec((1, hid_p), lambda i: (0, 0), **resident),
                    pl.BlockSpec((hid_p, cout_p), lambda i: (0, 0), **resident),
                    pl.BlockSpec((1, cout_p), lambda i: (0, 0), **resident),
                ],
                out_specs=pl.BlockSpec((tm, cout_p), lambda i: (i, 0)),
            )
            return pl.pallas_call(
                kernel,
                out_shape=out_shape,
                grid_spec=grid_spec,
                compiler_params=pltpu.CompilerParams(
                    dimension_semantics=("parallel",),
                    vmem_limit_bytes=int(vmem_limit)),
                cost_estimate=cost,
            )

        try:
            out_p = build(True)(x_p, w1_p, b1_p, w2_p, b2_p)
        except Exception:
            # Fallback: default (double) buffering if this JAX/Mosaic build
            # rejects single-buffered resident blocks.
            out_p = build(False)(x_p, w1_p, b1_p, w2_p, b2_p)
    else:
        # Choose the largest hidden-chunk (multiple of 128, divides hid_p) that
        # fits the VMEM budget.
        tk = 128
        for t in range(128, hid_p + 1, 128):
            if hid_p % t == 0 and _ktiled_vmem_bytes(
                    tm, t, cin_p, cout_p, x_bytes, out_bytes, ep_bytes) <= budget:
                tk = t
        # TODO(synk): no cin/cout feature tiling — extremely wide in/out dims
        # could still exceed VMEM; not needed for this module's sizes.

        kernel = functools.partial(_ktiled_kernel,
                                   compute_dtype=compute_dtype,
                                   epilogue_dtype=epilogue_dtype)
        grid_spec = pltpu.PrefetchScalarGridSpec(
            num_scalar_prefetch=0,
            grid=(n_p // tm, hid_p // tk),
            in_specs=[
                pl.BlockSpec((tm, cin_p), lambda i, k: (i, 0)),
                pl.BlockSpec((cin_p, tk), lambda i, k: (0, k)),
                pl.BlockSpec((1, tk), lambda i, k: (0, k)),
                pl.BlockSpec((tk, cout_p), lambda i, k: (k, 0)),
                pl.BlockSpec((1, cout_p), lambda i, k: (0, 0)),
            ],
            out_specs=pl.BlockSpec((tm, cout_p), lambda i, k: (i, 0)),
            scratch_shapes=[pltpu.VMEM((tm, cout_p), jnp.float32)],
        )
        out_p = pl.pallas_call(
            kernel,
            out_shape=out_shape,
            grid_spec=grid_spec,
            compiler_params=pltpu.CompilerParams(
                dimension_semantics=("parallel", "arbitrary"),
                vmem_limit_bytes=int(vmem_limit)),
            cost_estimate=cost,
        )(x_p, w1_p, b1_p, w2_p, b2_p)

    # Strip row / channel padding; output is already in x.dtype.
    return out_p[:n, :cout]


if __name__ == "__main__":
    # Deterministic parameters / inputs (synthetic; no checkpoint loading).
    in_channels, hidden_channels, out_channels = 16, 32, 16
    n_rows = 8

    key = jax.random.PRNGKey(0)
    kx, kw1, kb1, kw2, kb2 = jax.random.split(key, 5)

    x = jax.random.normal(kx, (n_rows, in_channels), dtype=jnp.float32)
    # nn.Linear weight shape: [out_features, in_features]
    w1 = jax.random.normal(kw1, (hidden_channels, in_channels), dtype=jnp.float32) * 0.1
    b1 = jax.random.normal(kb1, (hidden_channels,), dtype=jnp.float32) * 0.1
    w2 = jax.random.normal(kw2, (out_channels, hidden_channels), dtype=jnp.float32) * 0.1
    b2 = jax.random.normal(kb2, (out_channels,), dtype=jnp.float32) * 0.1

    params = prepare_mlp_params(w1, b1, w2, b2)   # one-time weight layout
    out = mlp_forward(x, params)
    out = jax.block_until_ready(out)

    # Reference check (plain JAX, f32). Matmul operands are bf16 in the kernel,
    # so use a bf16-appropriate tolerance.
    ref = jnp.tanh(jnp.tanh(x @ w1.T + b1) @ w2.T + b2)
    assert out.shape == (n_rows, out_channels)
    assert out.dtype == x.dtype
    assert jnp.allclose(out, ref, atol=3e-2, rtol=3e-2)

    print("KERNEL_OK")
</pallas_src>

<mosaic_0001>
module attributes {stable_mosaic.version = 11 : i64} {
  func.func @_resident_kernel(%arg0: i32, %arg1: memref<16x128xf32, #tpu.memory_space<vmem>>, %arg2: memref<128x128xbf16, #tpu.memory_space<vmem>>, %arg3: memref<1x128xf32, #tpu.memory_space<vmem>>, %arg4: memref<128x128xbf16, #tpu.memory_space<vmem>>, %arg5: memref<1x128xf32, #tpu.memory_space<vmem>>, %arg6: memref<16x128xf32, #tpu.memory_space<vmem>>) attributes {dimension_semantics = [#tpu.dimension_semantics<parallel>], iteration_bounds = array<i64: 1>, scalar_prefetch = 0 : i64, scratch_operands = 0 : i64, tpu.core_type = #tpu.core_type<tc>, window_params = [{transform_indices = @transform_0, window_bounds = array<i64: 16, 128>}, {pipeline_mode = #tpu.pipeline_mode<synchronous>, transform_indices = @transform_1, window_bounds = array<i64: 128, 128>}, {pipeline_mode = #tpu.pipeline_mode<synchronous>, transform_indices = @transform_2, window_bounds = array<i64: 1, 128>}, {pipeline_mode = #tpu.pipeline_mode<synchronous>, transform_indices = @transform_3, window_bounds = array<i64: 128, 128>}, {pipeline_mode = #tpu.pipeline_mode<synchronous>, transform_indices = @transform_4, window_bounds = array<i64: 1, 128>}, {transform_indices = @transform_5, window_bounds = array<i64: 16, 128>}]} {
    %c0 = arith.constant 0 : index
    %c0_0 = arith.constant 0 : index
    %0 = vector.load %arg1[%c0, %c0_0] : memref<16x128xf32, #tpu.memory_space<vmem>>, vector<16x128xf32>
    %1 = arith.truncf %0 : vector<16x128xf32> to vector<16x128xbf16>
    %c0_1 = arith.constant 0 : index
    %c0_2 = arith.constant 0 : index
    %2 = vector.load %arg2[%c0_1, %c0_2] : memref<128x128xbf16, #tpu.memory_space<vmem>>, vector<128x128xbf16>
    %cst = arith.constant dense<0.000000e+00> : vector<16x128xf32>
    %3 = tpu.matmul %1, %2, %cst {dimension_numbers = #tpu.dot_dimension_numbers<[1], [0], [0], [1], [0, 0, 1, 1], [], []>} : vector<16x128xbf16>, vector<128x128xbf16>, vector<16x128xf32> -> vector<16x128xf32>
    %c0_3 = arith.constant 0 : index
    %c0_4 = arith.constant 0 : index
    %4 = vector.load %arg3[%c0_3, %c0_4] : memref<1x128xf32, #tpu.memory_space<vmem>>, vector<1x128xf32>
    %5 = vector.broadcast %4 : vector<1x128xf32> to vector<16x128xf32>
    %6 = arith.addf %3, %5 : vector<16x128xf32>
    %7 = arith.truncf %6 : vector<16x128xf32> to vector<16x128xbf16>
    %8 = math.tanh %7 : vector<16x128xbf16>
    %c0_5 = arith.constant 0 : index
    %c0_6 = arith.constant 0 : index
    %9 = vector.load %arg4[%c0_5, %c0_6] : memref<128x128xbf16, #tpu.memory_space<vmem>>, vector<128x128xbf16>
    %cst_7 = arith.constant dense<0.000000e+00> : vector<16x128xf32>
    %10 = tpu.matmul %8, %9, %cst_7 {dimension_numbers = #tpu.dot_dimension_numbers<[1], [0], [0], [1], [0, 0, 1, 1], [], []>} : vector<16x128xbf16>, vector<128x128xbf16>, vector<16x128xf32> -> vector<16x128xf32>
    %c0_8 = arith.constant 0 : index
    %c0_9 = arith.constant 0 : index
    %11 = vector.load %arg5[%c0_8, %c0_9] : memref<1x128xf32, #tpu.memory_space<vmem>>, vector<1x128xf32>
    %12 = vector.broadcast %11 : vector<1x128xf32> to vector<16x128xf32>
    %13 = arith.addf %10, %12 : vector<16x128xf32>
    %14 = math.tanh %13 : vector<16x128xf32>
    %c0_10 = arith.constant 0 : index
    %c0_11 = arith.constant 0 : index
    %15 = vector.load %arg6[%c0_10, %c0_11] : memref<16x128xf32, #tpu.memory_space<vmem>>, vector<16x128xf32>
    tpu.vector_store %arg6[%c0_10, %c0_11], %14 {strides = array<i32>} : memref<16x128xf32, #tpu.memory_space<vmem>>, vector<16x128xf32>,
    return
  }
  func.func @transform_0(%arg0: i32) -> (i32, i32) {
    %c0_i32 = arith.constant 0 : i32
    %c0_i32_0 = arith.constant 0 : i32
    return %arg0, %c0_i32 : i32, i32
  }
  func.func @transform_1(%arg0: i32) -> (i32, i32) {
    %c0_i32 = arith.constant 0 : i32
    %c0_i32_0 = arith.constant 0 : i32
    %c0_i32_1 = arith.constant 0 : i32
    return %c0_i32, %c0_i32_0 : i32, i32
  }
  func.func @transform_2(%arg0: i32) -> (i32, i32) {
    %c0_i32 = arith.constant 0 : i32
    %c0_i32_0 = arith.constant 0 : i32
    %c0_i32_1 = arith.constant 0 : i32
    return %c0_i32, %c0_i32_0 : i32, i32
  }
  func.func @transform_3(%arg0: i32) -> (i32, i32) {
    %c0_i32 = arith.constant 0 : i32
    %c0_i32_0 = arith.constant 0 : i32
    %c0_i32_1 = arith.constant 0 : i32
    return %c0_i32, %c0_i32_0 : i32, i32
  }
  func.func @transform_4(%arg0: i32) -> (i32, i32) {
    %c0_i32 = arith.constant 0 : i32
    %c0_i32_0 = arith.constant 0 : i32
    %c0_i32_1 = arith.constant 0 : i32
    return %c0_i32, %c0_i32_0 : i32, i32
  }
  func.func @transform_5(%arg0: i32) -> (i32, i32) {
    %c0_i32 = arith.constant 0 : i32
    %c0_i32_0 = arith.constant 0 : i32
    return %arg0, %c0_i32 : i32, i32
  }
}

module attributes {stable_mosaic.version = 11 : i64} {
  func.func @_resident_kernel(%arg0: i32, %arg1: memref<16x128xf32, #tpu.memory_space<vmem>>, %arg2: memref<128x128xbf16, #tpu.memory_space<vmem>>, %arg3: memref<1x128xf32, #tpu.memory_space<vmem>>, %arg4: memref<128x128xbf16, #tpu.memory_space<vmem>>, %arg5: memref<1x128xf32, #tpu.memory_space<vmem>>, %arg6: memref<16x128xf32, #tpu.memory_space<vmem>>) attributes {dimension_semantics = [#tpu.dimension_semantics<parallel>], iteration_bounds = array<i64: 1>, scalar_prefetch = 0 : i64, scratch_operands = 0 : i64, tpu.core_type = #tpu.core_type<tc>, window_params = [{transform_indices = @transform_0, window_bounds = array<i64: 16, 128>}, {pipeline_mode = #tpu.pipeline_mode<synchronous>, transform_indices = @transform_1, window_bounds = array<i64: 128, 128>}, {pipeline_mode = #tpu.pipeline_mode<synchronous>, transform_indices = @transform_2, window_bounds = array<i64: 1, 128>}, {pipeline_mode = #tpu.pipeline_mode<synchronous>, transform_indices = @transform_3, window_bounds = array<i64: 128, 128>}, {pipeline_mode = #tpu.pipeline_mode<synchronous>, transform_indices = @transform_4, window_bounds = array<i64: 1, 128>}, {transform_indices = @transform_5, window_bounds = array<i64: 16, 128>}]} {
    %c0 = arith.constant 0 : index
    %c0_0 = arith.constant 0 : index
    %0 = vector.load %arg1[%c0, %c0_0] : memref<16x128xf32, #tpu.memory_space<vmem>>, vector<16x128xf32>
    %1 = arith.truncf %0 : vector<16x128xf32> to vector<16x128xbf16>
    %c0_1 = arith.constant 0 : index
    %c0_2 = arith.constant 0 : index
    %2 = vector.load %arg2[%c0_1, %c0_2] : memref<128x128xbf16, #tpu.memory_space<vmem>>, vector<128x128xbf16>
    %cst = arith.constant dense<0.000000e+00> : vector<16x128xf32>
    %3 = tpu.matmul %1, %2, %cst {dimension_numbers = #tpu.dot_dimension_numbers<[1], [0], [0], [1], [0, 0, 1, 1], [], []>} : vector<16x128xbf16>, vector<128x128xbf16>, vector<16x128xf32> -> vector<16x128xf32>
    %c0_3 = arith.constant 0 : index
    %c0_4 = arith.constant 0 : index
    %4 = vector.load %arg3[%c0_3, %c0_4] : memref<1x128xf32, #tpu.memory_space<vmem>>, vector<1x128xf32>
    %5 = vector.broadcast %4 : vector<1x128xf32> to vector<16x128xf32>
    %6 = arith.addf %3, %5 : vector<16x128xf32>
    %7 = arith.truncf %6 : vector<16x128xf32> to vector<16x128xbf16>
    %8 = math.tanh %7 : vector<16x128xbf16>
    %c0_5 = arith.constant 0 : index
    %c0_6 = arith.constant 0 : index
    %9 = vector.load %arg4[%c0_5, %c0_6] : memref<128x128xbf16, #tpu.memory_space<vmem>>, vector<128x128xbf16>
    %cst_7 = arith.constant dense<0.000000e+00> : vector<16x128xf32>
    %10 = tpu.matmul %8, %9, %cst_7 {dimension_numbers = #tpu.dot_dimension_numbers<[1], [0], [0], [1], [0, 0, 1, 1], [], []>} : vector<16x128xbf16>, vector<128x128xbf16>, vector<16x128xf32> -> vector<16x128xf32>
    %c0_8 = arith.constant 0 : index
    %c0_9 = arith.constant 0 : index
    %11 = vector.load %arg5[%c0_8, %c0_9] : memref<1x128xf32, #tpu.memory_space<vmem>>, vector<1x128xf32>
    %12 = vector.broadcast %11 : vector<1x128xf32> to vector<16x128xf32>
    %13 = arith.addf %10, %12 : vector<16x128xf32>
    %14 = math.tanh %13 : vector<16x128xf32>
    %c0_10 = arith.constant 0 : index
    %c0_11 = arith.constant 0 : index
    %15 = vector.load %arg6[%c0_10, %c0_11] : memref<16x128xf32, #tpu.memory_space<vmem>>, vector<16x128xf32>
    tpu.vector_store %arg6[%c0_10, %c0_11], %14 {strides = array<i32>} : memref<16x128xf32, #tpu.memory_space<vmem>>, vector<16x128xf32>,
    return
  }
  func.func @transform_0(%arg0: i32) -> (i32, i32) {
    %c0_i32 = arith.constant 0 : i32
    %c0_i32_0 = arith.constant 0 : i32
    return %arg0, %c0_i32 : i32, i32
  }
  func.func @transform_1(%arg0: i32) -> (i32, i32) {
    %c0_i32 = arith.constant 0 : i32
    %c0_i32_0 = arith.constant 0 : i32
    %c0_i32_1 = arith.constant 0 : i32
    return %c0_i32, %c0_i32_0 : i32, i32
  }
  func.func @transform_2(%arg0: i32) -> (i32, i32) {
    %c0_i32 = arith.constant 0 : i32
    %c0_i32_0 = arith.constant 0 : i32
    %c0_i32_1 = arith.constant 0 : i32
    return %c0_i32, %c0_i32_0 : i32, i32
  }
  func.func @transform_3(%arg0: i32) -> (i32, i32) {
    %c0_i32 = arith.constant 0 : i32
    %c0_i32_0 = arith.constant 0 : i32
    %c0_i32_1 = arith.constant 0 : i32
    return %c0_i32, %c0_i32_0 : i32, i32
  }
  func.func @transform_4(%arg0: i32) -> (i32, i32) {
    %c0_i32 = arith.constant 0 : i32
    %c0_i32_0 = arith.constant 0 : i32
    %c0_i32_1 = arith.constant 0 : i32
    return %c0_i32, %c0_i32_0 : i32, i32
  }
  func.func @transform_5(%arg0: i32) -> (i32, i32) {
    %c0_i32 = arith.constant 0 : i32
    %c0_i32_0 = arith.constant 0 : i32
    return %arg0, %c0_i32 : i32, i32
  }
}

</mosaic_0001>

<bundles_post_ra>
// kernel: tpu_custom_call.1
= control target key start
LH: loop header
LB: loop body
LE: loop exit
PB: predicated region body
PF: predicated region fallthrough
CT: control target
= control target key end

     0   :  { %10 = vsyncpa [#allocation3], 0  ;;  %s572_s0 = inlined_call_operand.hbm [shape: f32[16,128], index: 0, kind: input, shape index: {}]   ;;  %s573_s1 = inlined_call_operand.hbm [shape: bf16[128,128], index: 1, kind: input, shape index: {}]   ;;  %s574_s2 = inlined_call_operand.vmem [shape: f32[1,128], index: 2, kind: input, shape index: {}]   ;;  %s575_s3 = inlined_call_operand.hbm [shape: bf16[128,128], index: 3, kind: input, shape index: {}]   ;;  %s576_s4 = inlined_call_operand.vmem [shape: f32[1,128], index: 4, kind: input, shape index: {}]   ;;  %s577_s5 = inlined_call_operand.hbm [shape: f32[16,128], index: 5, kind: output, shape index: {}]  }
   0x1   :  { %11 = vsyncpa [#allocation6], 0 }
   0x2   :  { %12 = vsyncpa [#allocation4], 0  ;;  %s508_s18 = smov [#allocation5]  }
   0x3   :  { %s30_s19 = sshll.u32 %s508_s18, 4  ;;  %s31_s19 = int_to_ptr.vmem [resolvable:$true] %s30_s19 }
   0x4   :  { %s430_s20 = scalar_lea.vmem %s31_s19, 1024  ;;  %p435_p1 = scmp.lt.s32.totalorder %s31_s19, %s31_s19 }
   0x5   :  { %p431_p0 = scmp.ne.s32.totalorder %s31_s19, %s430_s20  ;;  %p436_p2 = scmp.lt.s32.totalorder %s430_s20, %s430_s20 }
   0x7   :  { %p437_p3 = por %p436_p2, %p435_p1 }
   0x9   :  { %p438_p4 = pnand %p437_p3, %p431_p0 }
   0xb   :  { %441 = shalt.err (!%p438_p4)
}
   0xc   :  { %s509_s21 = smov 64   ;;  %s510_s22 = smov 4  }
   0xd   :  { %36 = dma.hbm_to_vmem [thread:$0]  %s573_s1, 1024, %s31_s19, [#allocation6], %s509_s21, %s509_s21, %s510_s22  }
   0xe   :  { %s511_s25 = smov [#allocation2]  }
   0xf   :  { %s18_s26 = sshll.u32 %s511_s25, 4  ;;  %s19_s26 = int_to_ptr.vmem [resolvable:$true] %s18_s26 }
  0x10   :  { %s450_s27 = scalar_lea.vmem %s19_s26, 256  ;;  %p455_p6 = scmp.lt.s32.totalorder %s19_s26, %s19_s26 }
  0x11   :  { %p451_p5 = scmp.ne.s32.totalorder %s19_s26, %s450_s27  ;;  %p456_p7 = scmp.lt.s32.totalorder %s450_s27, %s450_s27 }
  0x13   :  { %p457_p8 = por %p456_p7, %p455_p6 }
  0x15   :  { %p458_p9 = pnand %p457_p8, %p451_p5 }
  0x17   :  { %461 = shalt.err (!%p458_p9)
}
  0x18   :  { %s512_s28 = smov 128   ;;  %s513_s29 = smov 8  }
  0x19   :  { %24 = dma.hbm_to_vmem [thread:$0]  %s572_s0, 256, %s19_s26, [#allocation3], %s512_s28, %s512_s28, %s513_s29  }
  0x1a   :  { %s514_s1 = smov [#allocation7]  }
  0x1b   :  { %s44_s7 = sshll.u32 %s514_s1, 4  ;;  %s45_s7 = int_to_ptr.vmem [resolvable:$true] %s44_s7 }
  0x1c   :  { %s470_s8 = scalar_lea.vmem %s45_s7, 1024  ;;  %p475_p11 = scmp.lt.s32.totalorder %s45_s7, %s45_s7 }
  0x1d   :  { %p471_p10 = scmp.ne.s32.totalorder %s45_s7, %s470_s8  ;;  %p476_p12 = scmp.lt.s32.totalorder %s470_s8, %s470_s8 }
  0x1f   :  { %p477_p13 = por %p476_p12, %p475_p11 }
  0x21   :  { %p478_p0 = pnand %p477_p13, %p471_p10 }
  0x23   :  { %481 = shalt.err (!%p478_p0)
}
  0x24   :  { %50 = dma.hbm_to_vmem [thread:$0]  %s575_s3, 1024, %s45_s7, [#allocation6], %s509_s21, %s509_s21, %s510_s22  }
  0x25   :  { %502 = dma.done.wait [#allocation3], 256  }
  0x26   :  { %503 = vsyncadd [#allocation3], 4294967040 }
  0x27   :  { %504 = dma.done.wait [#allocation6], 2048  }
  0x28   :  { %505 = vsyncadd [#allocation6], 4294965248  ;;  %v515_v0 = vmov 0.0   ;;  %vm516_vm0 = vmmov 0   ;;  %v400_v1 = vld [vmem:[#allocation5 + $0x38] sm:$0xff]   ;;  %v401_v2 = vld [vmem:[#allocation5 + $0x30] sm:$0xff]  }
  0x29   :  { %350 = vmatprep.subr.bf16.mxu0 %v515_v0  ;;  %366 = vmatprep.mubr.msk.bf16.mxu0 %vm516_vm0, %v515_v0  ;;  %v402_v3 = vld [vmem:[#allocation5 + $0x28] sm:$0xff]   ;;  %v408_v4 = vld [vmem:[#allocation7 + $0x38] sm:$0xff]   ;;  %v403_v5 = vld [vmem:[#allocation5 + $0x20] sm:$0xff]  }
  0x2a   :  { %370 = vmatprep.subr.bf16.mxu1 %v515_v0  ;;  %386 = vmatprep.mubr.msk.bf16.mxu1 %vm516_vm0, %v515_v0  ;;  %v409_v6 = vld [vmem:[#allocation7 + $0x30] sm:$0xff]   ;;  %v404_v7 = vld [vmem:[#allocation5 + $0x18] sm:$0xff]   ;;  %v406_v9 = vld [vmem:[#allocation5 + $0x8] sm:$0xff]  }
  0x2b   :  { %351 = vmatpush3.bf16.msra.mxu0 %v400_v1  ;;  %371 = vmatpush3.bf16.msra.mxu1 %v408_v4  ;;  %v405_v8 = vld [vmem:[#allocation5 + $0x10] sm:$0xff]   ;;  %v407_v10 = vld [vmem:[#allocation5] sm:$0xff]   ;;  %v64_v12 = vld [vmem:[#allocation2 + $0x8] sm:$0xff] }
  0x2c   :  { %352 = vmatprep.subr.bf16.mxu0 %v515_v0  ;;  %372 = vmatprep.subr.bf16.mxu1 %v515_v0  ;;  %v63_v11 = vld [vmem:[#allocation2] sm:$0xff]  ;;  %v410_v14 = vld [vmem:[#allocation7 + $0x28] sm:$0xff]   ;;  %v411_v15 = vld [vmem:[#allocation7 + $0x20] sm:$0xff]  }
  0x2d   :  { %v65_v13 = vpack.c.bf16 %v64_v12, %v63_v11  ;;  %v412_v16 = vld [vmem:[#allocation7 + $0x18] sm:$0xff]   ;;  %v413_v17 = vld [vmem:[#allocation7 + $0x10] sm:$0xff]   ;;  %v414_v18 = vld [vmem:[#allocation7 + $0x8] sm:$0xff]  }
  0x2e   :  { %v415_v19 = vld [vmem:[#allocation7] sm:$0xff]   ;;  %v314_v21 = vld [vmem:[%s574_s2] ss:$0 sm:$0xff]  ;;  %s517_s2 = smov [#allocation8]  }
  0x2f   :  { %353 = vmatpush3.bf16.msra.mxu0 %v401_v2  ;;  %373 = vmatpush3.bf16.msra.mxu1 %v409_v6  ;;  %v323_v29 = vld [vmem:[%s576_s4] ss:$0 sm:$0xff]  ;;  %s301_s13 = sshll.u32 %s517_s2, 4  ;;  %s302_s13 = int_to_ptr.vmem [resolvable:$true] %s301_s13 }
  0x30   :  { %354 = vmatprep.subr.bf16.mxu0 %v515_v0  ;;  %374 = vmatprep.subr.bf16.mxu1 %v515_v0  ;;  %s482_s14 = scalar_lea.vmem %s302_s13, 256  ;;  %p487_p2 = scmp.lt.s32.totalorder %s302_s13, %s302_s13 }
  0x31   :  { %p483_p1 = scmp.ne.s32.totalorder %s302_s13, %s482_s14  ;;  %p488_p3 = scmp.lt.s32.totalorder %s482_s14, %s482_s14 }
  0x33   :  { %355 = vmatpush3.bf16.msra.mxu0 %v402_v3  ;;  %375 = vmatpush3.bf16.msra.mxu1 %v410_v14  ;;  %p489_p4 = por %p488_p3, %p487_p2 }
  0x34   :  { %356 = vmatprep.subr.bf16.mxu0 %v515_v0  ;;  %376 = vmatprep.subr.bf16.mxu1 %v515_v0 }
  0x35   :  { %p490_p5 = pnand %p489_p4, %p483_p1 }
  0x37   :  { %357 = vmatpush3.bf16.msra.mxu0 %v403_v5  ;;  %377 = vmatpush3.bf16.msra.mxu1 %v411_v15 }
  0x38   :  { %358 = vmatprep.subr.bf16.mxu0 %v515_v0  ;;  %378 = vmatprep.subr.bf16.mxu1 %v515_v0 }
  0x3b   :  { %359 = vmatpush3.bf16.msra.mxu0 %v404_v7  ;;  %379 = vmatpush3.bf16.msra.mxu1 %v412_v16 }
  0x3c   :  { %360 = vmatprep.subr.bf16.mxu0 %v515_v0  ;;  %380 = vmatprep.subr.bf16.mxu1 %v515_v0 }
  0x3f   :  { %361 = vmatpush3.bf16.msra.mxu0 %v405_v8  ;;  %381 = vmatpush3.bf16.msra.mxu1 %v413_v17 }
  0x40   :  { %362 = vmatprep.subr.bf16.mxu0 %v515_v0  ;;  %382 = vmatprep.subr.bf16.mxu1 %v515_v0 }
  0x43   :  { %363 = vmatpush3.bf16.msra.mxu0 %v406_v9  ;;  %383 = vmatpush3.bf16.msra.mxu1 %v414_v18 }
  0x44   :  { %364 = vmatprep.subr.bf16.mxu0 %v515_v0  ;;  %384 = vmatprep.subr.bf16.mxu1 %v515_v0 }
  0x47   :  { %365 = vmatpush3.bf16.msra.mxu0 %v407_v10  ;;  %385 = vmatpush3.bf16.msra.mxu1 %v415_v19 }
  0x4a   :  { %367 = vmatmul.mubr.bf16.vlgmr.msra.gmra.mxu0 %v65_v13 }
 0x10a   :  { %v171_v20 = vpop.f32.mrf.mxu0 }
 0x10b   :  { %v172_v24 = vadd.f32 %v314_v21, %v171_v20 }
 0x10c   :  { %v368_v22 = vpop.f32.mrf.mxu0 }
 0x10e   :  { %v174_v23 = vpop.f32.mrf.mxu0 }
 0x10f   :  { %v175_v25 = vadd.f32 %v314_v21, %v174_v23 }
 0x110   :  { %v369_v26 = vpop.f32.mrf.mxu0 }
 0x111   :  { %v178_v27 = vpack.c.bf16 %v175_v25, %v172_v24 }
 0x113   :  { %416 = vtanh.bf16 %v178_v27 }
 0x121   :  { %v417_v28 = vpop.eup %416 }
 0x122   :  { %387 = vmatmul.mubr.bf16.vlgmr.msra.gmra.mxu1 %v417_v28 }
 0x1e2   :  { %v285_v30 = vpop.f32.mrf.mxu1 }
 0x1e3   :  { %v286_v31 = vadd.f32 %v323_v29, %v285_v30 }
 0x1e4   :  { %v388_v32 = vpop.f32.mrf.mxu1 }
 0x1e5   :  { %418 = vtanh.f32 %v286_v31 }
 0x1e6   :  { %v288_v33 = vpop.f32.mrf.mxu1 }
 0x1e7   :  { %v289_v34 = vadd.f32 %v323_v29, %v288_v33 }
 0x1e8   :  { %v389_v35 = vpop.f32.mrf.mxu1 }
 0x1e9   :  { %420 = vtanh.f32 %v289_v34 }
 0x1f2   :  { %v419_v36 = vpop.eup %418 }
 0x1f3   :  { %294 = vst [vmem:[#allocation8] sm:$0xff] %v419_v36 }
 0x1f6   :  { %v421_v37 = vpop.eup %420 }
 0x1f7   :  { %295 = vst [vmem:[#allocation8 + $0x8] sm:$0xff] %v421_v37 }
 0x1f8   :  { %493 = shalt.err (!%p490_p5)
}
 0x1f9   :  { %307 = dma.vmem_to_hbm [thread:$0]  %s302_s13, 256, %s577_s5, [#allocation4], %s512_s28, %s512_s28, %s513_s29  }
 0x1fa   :  { %506 = dma.done.wait [#allocation4], 256  }
 0x1fb   :  { %507 = vsyncadd [#allocation4], 4294967040 }
 0x1fc   :  { %311 = vsyncpa [#allocation3], 1 }
 0x1fd   :  { %312 = vsyncpa [#allocation6], 1 }
 0x1fe   :  { %313 = vsyncpa [#allocation4], 1 }

// kernel: tpu_custom_call.1
= control target key start
LH: loop header
LB: loop body
LE: loop exit
PB: predicated region body
PF: predicated region fallthrough
CT: control target
= control target key end

     0   :  { %10 = vsyncpa [#allocation3], 0  ;;  %s572_s0 = inlined_call_operand.hbm [shape: f32[16,128], index: 0, kind: input, shape index: {}]   ;;  %s573_s1 = inlined_call_operand.hbm [shape: bf16[128,128], index: 1, kind: input, shape index: {}]   ;;  %s574_s2 = inlined_call_operand.vmem [shape: f32[1,128], index: 2, kind: input, shape index: {}]   ;;  %s575_s3 = inlined_call_operand.hbm [shape: bf16[128,128], index: 3, kind: input, shape index: {}]   ;;  %s576_s4 = inlined_call_operand.vmem [shape: f32[1,128], index: 4, kind: input, shape index: {}]   ;;  %s577_s5 = inlined_call_operand.hbm [shape: f32[16,128], index: 5, kind: output, shape index: {}]  }
   0x1   :  { %11 = vsyncpa [#allocation6], 0 }
   0x2   :  { %12 = vsyncpa [#allocation4], 0  ;;  %s508_s18 = smov [#allocation5]  }
   0x3   :  { %s30_s19 = sshll.u32 %s508_s18, 4  ;;  %s31_s19 = int_to_ptr.vmem [resolvable:$true] %s30_s19 }
   0x4   :  { %s430_s20 = scalar_lea.vmem %s31_s19, 1024  ;;  %p435_p1 = scmp.lt.s32.totalorder %s31_s19, %s31_s19 }
   0x5   :  { %p431_p0 = scmp.ne.s32.totalorder %s31_s19, %s430_s20  ;;  %p436_p2 = scmp.lt.s32.totalorder %s430_s20, %s430_s20 }
   0x7   :  { %p437_p3 = por %p436_p2, %p435_p1 }
   0x9   :  { %p438_p4 = pnand %p437_p3, %p431_p0 }
   0xb   :  { %441 = shalt.err (!%p438_p4)
}
   0xc   :  { %s509_s21 = smov 64   ;;  %s510_s22 = smov 4  }
   0xd   :  { %36 = dma.hbm_to_vmem [thread:$0]  %s573_s1, 1024, %s31_s19, [#allocation6], %s509_s21, %s509_s21, %s510_s22  }
   0xe   :  { %s511_s25 = smov [#allocation2]  }
   0xf   :  { %s18_s26 = sshll.u32 %s511_s25, 4  ;;  %s19_s26 = int_to_ptr.vmem [resolvable:$true] %s18_s26 }
  0x10   :  { %s450_s27 = scalar_lea.vmem %s19_s26, 256  ;;  %p455_p6 = scmp.lt.s32.totalorder %s19_s26, %s19_s26 }
  0x11   :  { %p451_p5 = scmp.ne.s32.totalorder %s19_s26, %s450_s27  ;;  %p456_p7 = scmp.lt.s32.totalorder %s450_s27, %s450_s27 }
  0x13   :  { %p457_p8 = por %p456_p7, %p455_p6 }
  0x15   :  { %p458_p9 = pnand %p457_p8, %p451_p5 }
  0x17   :  { %461 = shalt.err (!%p458_p9)
}
  0x18   :  { %s512_s28 = smov 128   ;;  %s513_s29 = smov 8  }
  0x19   :  { %24 = dma.hbm_to_vmem [thread:$0]  %s572_s0, 256, %s19_s26, [#allocation3], %s512_s28, %s512_s28, %s513_s29  }
  0x1a   :  { %s514_s1 = smov [#allocation7]  }
  0x1b   :  { %s44_s7 = sshll.u32 %s514_s1, 4  ;;  %s45_s7 = int_to_ptr.vmem [resolvable:$true] %s44_s7 }
  0x1c   :  { %s470_s8 = scalar_lea.vmem %s45_s7, 1024  ;;  %p475_p11 = scmp.lt.s32.totalorder %s45_s7, %s45_s7 }
  0x1d   :  { %p471_p10 = scmp.ne.s32.totalorder %s45_s7, %s470_s8  ;;  %p476_p12 = scmp.lt.s32.totalorder %s470_s8, %s470_s8 }
  0x1f   :  { %p477_p13 = por %p476_p12, %p475_p11 }
  0x21   :  { %p478_p0 = pnand %p477_p13, %p471_p10 }
  0x23   :  { %481 = shalt.err (!%p478_p0)
}
  0x24   :  { %50 = dma.hbm_to_vmem [thread:$0]  %s575_s3, 1024, %s45_s7, [#allocation6], %s509_s21, %s509_s21, %s510_s22  }
  0x25   :  { %502 = dma.done.wait [#allocation3], 256  }
  0x26   :  { %503 = vsyncadd [#allocation3], 4294967040 }
  0x27   :  { %504 = dma.done.wait [#allocation6], 2048  }
  0x28   :  { %505 = vsyncadd [#allocation6], 4294965248  ;;  %v515_v0 = vmov 0.0   ;;  %vm516_vm0 = vmmov 0   ;;  %v400_v1 = vld [vmem:[#allocation5 + $0x38] sm:$0xff]   ;;  %v401_v2 = vld [vmem:[#allocation5 + $0x30] sm:$0xff]  }
  0x29   :  { %350 = vmatprep.subr.bf16.mxu0 %v515_v0  ;;  %366 = vmatprep.mubr.msk.bf16.mxu0 %vm516_vm0, %v515_v0  ;;  %v402_v3 = vld [vmem:[#allocation5 + $0x28] sm:$0xff]   ;;  %v408_v4 = vld [vmem:[#allocation7 + $0x38] sm:$0xff]   ;;  %v403_v5 = vld [vmem:[#allocation5 + $0x20] sm:$0xff]  }
  0x2a   :  { %370 = vmatprep.subr.bf16.mxu1 %v515_v0  ;;  %386 = vmatprep.mubr.msk.bf16.mxu1 %vm516_vm0, %v515_v0  ;;  %v409_v6 = vld [vmem:[#allocation7 + $0x30] sm:$0xff]   ;;  %v404_v7 = vld [vmem:[#allocation5 + $0x18] sm:$0xff]   ;;  %v406_v9 = vld [vmem:[#allocation5 + $0x8] sm:$0xff]  }
  0x2b   :  { %351 = vmatpush3.bf16.msra.mxu0 %v400_v1  ;;  %371 = vmatpush3.bf16.msra.mxu1 %v408_v4  ;;  %v405_v8 = vld [vmem:[#allocation5 + $0x10] sm:$0xff]   ;;  %v407_v10 = vld [vmem:[#allocation5] sm:$0xff]   ;;  %v64_v12 = vld [vmem:[#allocation2 + $0x8] sm:$0xff] }
  0x2c   :  { %352 = vmatprep.subr.bf16.mxu0 %v515_v0  ;;  %372 = vmatprep.subr.bf16.mxu1 %v515_v0  ;;  %v63_v11 = vld [vmem:[#allocation2] sm:$0xff]  ;;  %v410_v14 = vld [vmem:[#allocation7 + $0x28] sm:$0xff]   ;;  %v411_v15 = vld [vmem:[#allocation7 + $0x20] sm:$0xff]  }
  0x2d   :  { %v65_v13 = vpack.c.bf16 %v64_v12, %v63_v11  ;;  %v412_v16 = vld [vmem:[#allocation7 + $0x18] sm:$0xff]   ;;  %v413_v17 = vld [vmem:[#allocation7 + $0x10] sm:$0xff]   ;;  %v414_v18 = vld [vmem:[#allocation7 + $0x8] sm:$0xff]  }
  0x2e   :  { %v415_v19 = vld [vmem:[#allocation7] sm:$0xff]   ;;  %v314_v21 = vld [vmem:[%s574_s2] ss:$0 sm:$0xff]  ;;  %s517_s2 = smov [#allocation8]  }
  0x2f   :  { %353 = vmatpush3.bf16.msra.mxu0 %v401_v2  ;;  %373 = vmatpush3.bf16.msra.mxu1 %v409_v6  ;;  %v323_v29 = vld [vmem:[%s576_s4] ss:$0 sm:$0xff]  ;;  %s301_s13 = sshll.u32 %s517_s2, 4  ;;  %s302_s13 = int_to_ptr.vmem [resolvable:$true] %s301_s13 }
  0x30   :  { %354 = vmatprep.subr.bf16.mxu0 %v515_v0  ;;  %374 = vmatprep.subr.bf16.mxu1 %v515_v0  ;;  %s482_s14 = scalar_lea.vmem %s302_s13, 256  ;;  %p487_p2 = scmp.lt.s32.totalorder %s302_s13, %s302_s13 }
  0x31   :  { %p483_p1 = scmp.ne.s32.totalorder %s302_s13, %s482_s14  ;;  %p488_p3 = scmp.lt.s32.totalorder %s482_s14, %s482_s14 }
  0x33   :  { %355 = vmatpush3.bf16.msra.mxu0 %v402_v3  ;;  %375 = vmatpush3.bf16.msra.mxu1 %v410_v14  ;;  %p489_p4 = por %p488_p3, %p487_p2 }
  0x34   :  { %356 = vmatprep.subr.bf16.mxu0 %v515_v0  ;;  %376 = vmatprep.subr.bf16.mxu1 %v515_v0 }
  0x35   :  { %p490_p5 = pnand %p489_p4, %p483_p1 }
  0x37   :  { %357 = vmatpush3.bf16.msra.mxu0 %v403_v5  ;;  %377 = vmatpush3.bf16.msra.mxu1 %v411_v15 }
  0x38   :  { %358 = vmatprep.subr.bf16.mxu0 %v515_v0  ;;  %378 = vmatprep.subr.bf16.mxu1 %v515_v0 }
  0x3b   :  { %359 = vmatpush3.bf16.msra.mxu0 %v404_v7  ;;  %379 = vmatpush3.bf16.msra.mxu1 %v412_v16 }
  0x3c   :  { %360 = vmatprep.subr.bf16.mxu0 %v515_v0  ;;  %380 = vmatprep.subr.bf16.mxu1 %v515_v0 }
  0x3f   :  { %361 = vmatpush3.bf16.msra.mxu0 %v405_v8  ;;  %381 = vmatpush3.bf16.msra.mxu1 %v413_v17 }
  0x40   :  { %362 = vmatprep.subr.bf16.mxu0 %v515_v0  ;;  %382 = vmatprep.subr.bf16.mxu1 %v515_v0 }
  0x43   :  { %363 = vmatpush3.bf16.msra.mxu0 %v406_v9  ;;  %383 = vmatpush3.bf16.msra.mxu1 %v414_v18 }
  0x44   :  { %364 = vmatprep.subr.bf16.mxu0 %v515_v0  ;;  %384 = vmatprep.subr.bf16.mxu1 %v515_v0 }
  0x47   :  { %365 = vmatpush3.bf16.msra.mxu0 %v407_v10  ;;  %385 = vmatpush3.bf16.msra.mxu1 %v415_v19 }
  0x4a   :  { %367 = vmatmul.mubr.bf16.vlgmr.msra.gmra.mxu0 %v65_v13 }
 0x10a   :  { %v171_v20 = vpop.f32.mrf.mxu0 }
 0x10b   :  { %v172_v24 = vadd.f32 %v314_v21, %v171_v20 }
 0x10c   :  { %v368_v22 = vpop.f32.mrf.mxu0 }
 0x10e   :  { %v174_v23 = vpop.f32.mrf.mxu0 }
 0x10f   :  { %v175_v25 = vadd.f32 %v314_v21, %v174_v23 }
 0x110   :  { %v369_v26 = vpop.f32.mrf.mxu0 }
 0x111   :  { %v178_v27 = vpack.c.bf16 %v175_v25, %v172_v24 }
 0x113   :  { %416 = vtanh.bf16 %v178_v27 }
 0x121   :  { %v417_v28 = vpop.eup %416 }
 0x122   :  { %387 = vmatmul.mubr.bf16.vlgmr.msra.gmra.mxu1 %v417_v28 }
 0x1e2   :  { %v285_v30 = vpop.f32.mrf.mxu1 }
 0x1e3   :  { %v286_v31 = vadd.f32 %v323_v29, %v285_v30 }
 0x1e4   :  { %v388_v32 = vpop.f32.mrf.mxu1 }
 0x1e5   :  { %418 = vtanh.f32 %v286_v31 }
 0x1e6   :  { %v288_v33 = vpop.f32.mrf.mxu1 }
 0x1e7   :  { %v289_v34 = vadd.f32 %v323_v29, %v288_v33 }
 0x1e8   :  { %v389_v35 = vpop.f32.mrf.mxu1 }
 0x1e9   :  { %420 = vtanh.f32 %v289_v34 }
 0x1f2   :  { %v419_v36 = vpop.eup %418 }
 0x1f3   :  { %294 = vst [vmem:[#allocation8] sm:$0xff] %v419_v36 }
 0x1f6   :  { %v421_v37 = vpop.eup %420 }
 0x1f7   :  { %295 = vst [vmem:[#allocation8 + $0x8] sm:$0xff] %v421_v37 }
 0x1f8   :  { %493 = shalt.err (!%p490_p5)
}
 0x1f9   :  { %307 = dma.vmem_to_hbm [thread:$0]  %s302_s13, 256, %s577_s5, [#allocation4], %s512_s28, %s512_s28, %s513_s29  }
 0x1fa   :  { %506 = dma.done.wait [#allocation4], 256  }
 0x1fb   :  { %507 = vsyncadd [#allocation4], 4294967040 }
 0x1fc   :  { %311 = vsyncpa [#allocation3], 1 }
 0x1fd   :  { %312 = vsyncpa [#allocation6], 1 }
 0x1fe   :  { %313 = vsyncpa [#allocation4], 1 }

</bundles_post_ra>
